<compile_context>
chip_gen: v7x
topology: tpu7x:2x2x1
jax: 0.10.0
libtpu: 0.0.40
codegen_flags: <defaults>
</compile_context>

<pallas_src>
import functools
from collections import namedtuple

import jax
import jax.numpy as jnp
from jax.experimental import pallas as pl
from jax.experimental.pallas import tpu as pltpu


def _round_up(a: int, b: int) -> int:
    return ((a + b - 1) // b) * b


_ChipParams = namedtuple(
    "_ChipParams", ["tile_bytes", "vmem_limit_bytes", "two_cores", "bf16_compute"]
)


@functools.lru_cache(maxsize=1)
def _chip_params() -> _ChipParams:
    """Per-generation tile / VMEM / compute-dtype defaults."""
    kind = ""
    try:
        kind = jax.devices()[0].device_kind.lower()
    except Exception:
        pass
    vmem_cap = None
    try:
        vmem_cap = int(pltpu.get_tpu_info().vmem_capacity_bytes)
    except Exception:
        vmem_cap = None

    is_v7 = ("v7" in kind) or ("7x" in kind) or (
        vmem_cap is not None and vmem_cap <= 80 * 2**20
    )
    if is_v7:
        # v7x: ~3.2 TB/s HBM per TC, 64 MiB physical VMEM, 2 TensorCores/chip.
        # 8 MiB tiles -> 32 MiB of double buffers; raise scoped VMEM to 48 MiB.
        return _ChipParams(8 * 2**20, 48 * 2**20, True, True)
    if "v6" in kind:
        # v6e: ~1.4 TB/s HBM, 128 MiB physical VMEM (32 MiB default scoped).
        return _ChipParams(4 * 2**20, 32 * 2**20, False, True)
    if "v5" in kind:
        # v5e: 16 MiB default scoped VMEM -> keep 2 MiB tiles (4 live buffers
        # = 8 MiB).  No bf16 VPU/EUP -> f32 compute.
        return _ChipParams(2 * 2**20, None, False, False)
    # Unknown / older generation: conservative defaults.
    return _ChipParams(2 * 2**20, None, False, False)


def _make_gelu_kernel(compute_dtype):
    def _gelu_kernel(x_ref, o_ref):
        x = x_ref[...].astype(compute_dtype)
        # quick GELU: x * sigmoid(1.702 * x)
        o_ref[...] = (x * jax.nn.sigmoid(1.702 * x)).astype(o_ref.dtype)

    return _gelu_kernel


def _run_2d(x2: jax.Array) -> jax.Array:
    """Run the elementwise GELU kernel over a 2-D (rows, cols) view."""
    R, C = x2.shape
    dtype = x2.dtype
    itemsize = jnp.dtype(dtype).itemsize
    params = _chip_params()

    sub = max(8, 32 // itemsize)              # native sublane multiple: 8/16/32
    lane_pad_c = _round_up(max(C, 1), 128)    # lane-padded width (VMEM footprint)
    row_bytes = lane_pad_c * itemsize

    if sub * row_bytes <= params.tile_bytes:
        # Full-width, contiguous row slabs; shrink row count to fit budget.
        tc = C
        tr = max(sub, ((params.tile_bytes // row_bytes) // sub) * sub)
        if tr >= R:
            tr = R                            # full dim is always legal
    else:
        # Even one sublane-group of full-width rows blows the budget:
        # split columns into 128-multiples, keep a minimal row slab.
        tr = R if R <= sub else sub
        tc = max(128, ((params.tile_bytes // (tr * itemsize)) // 128) * 128)
        if tc >= C:
            tc = C

    nr = pl.cdiv(R, tr)
    nc = pl.cdiv(C, tc)

    # v7x has 2 TensorCores: a mid-sized array that fits one tile should still
    # produce >= 2 parallel grid steps so both cores get work.
    if params.two_cores and nr * nc == 1 and R > sub and R * row_bytes > (1 << 20):
        tr = _round_up(pl.cdiv(R, 2), sub)
        nr = pl.cdiv(R, tr)

    if nc == 1:
        grid = (nr,)
        in_spec = pl.BlockSpec((tr, tc), lambda i: (i, 0))
        out_spec = pl.BlockSpec((tr, tc), lambda i: (i, 0))
        dims = ("parallel",)
    else:
        grid = (nr, nc)
        in_spec = pl.BlockSpec((tr, tc), lambda i, j: (i, j))
        out_spec = pl.BlockSpec((tr, tc), lambda i, j: (i, j))
        dims = ("parallel", "parallel")

    # bf16-native compute on chips whose VPU/EUP support it; f32 elsewhere.
    if dtype == jnp.bfloat16 and params.bf16_compute:
        compute_dtype = jnp.bfloat16
    else:
        compute_dtype = jnp.float32

    cp_kwargs = dict(dimension_semantics=dims)
    if params.vmem_limit_bytes is not None:
        cp_kwargs["vmem_limit_bytes"] = params.vmem_limit_bytes

    return pl.pallas_call(
        _make_gelu_kernel(compute_dtype),
        out_shape=jax.ShapeDtypeStruct((R, C), dtype),
        grid_spec=pltpu.PrefetchScalarGridSpec(
            num_scalar_prefetch=0,
            grid=grid,
            in_specs=[in_spec],
            out_specs=out_spec,
        ),
        compiler_params=pltpu.CompilerParams(**cp_kwargs),
    )(x2)


def gelu(x: jax.Array) -> jax.Array:
    """Elementwise quick-GELU (x * sigmoid(1.702 * x)) via a tiled Pallas kernel."""
    orig_shape = x.shape
    if x.size == 0:
        return x
    if x.ndim >= 2:
        # Collapsing leading dims is a free view; no pad / slice round-trips.
        x2 = x.reshape(-1, orig_shape[-1])
    else:
        # 0-D / 1-D: present as a single lane-major row.
        x2 = x.reshape(1, -1)
    return _run_2d(x2).reshape(orig_shape)


def gelu_ref(x: jax.Array) -> jax.Array:
    xf = x.astype(jnp.float32)
    return (xf * jax.nn.sigmoid(1.702 * xf)).astype(x.dtype)


if __name__ == "__main__":
    key = jax.random.PRNGKey(0)
    k1, k2, k3 = jax.random.split(key, 3)

    # Lane-sparse trailing dim (32) -> full-width block, no padding round-trips.
    x_small = jax.random.normal(k1, (2, 8, 32), dtype=jnp.float32)
    # Lane-aligned trailing dim (256).
    x_aligned = jax.random.normal(k2, (2, 16, 256), dtype=jnp.float32)
    # 1-D ragged length.
    x_1d = jax.random.normal(k3, (300,), dtype=jnp.float32)

    for xin in (x_small, x_aligned, x_1d):
        y = gelu(xin)
        jax.block_until_ready(y)
        y_ref = gelu_ref(xin)
        assert y.shape == xin.shape and y.dtype == xin.dtype
        assert jnp.allclose(y, y_ref, atol=1e-6, rtol=1e-6)

    # bf16 sanity check (bf16-native compute on v6e/v7x -> looser tolerance).
    x_bf16 = jax.random.normal(k1, (4, 128), dtype=jnp.bfloat16)
    y_bf16 = gelu(x_bf16)
    jax.block_until_ready(y_bf16)
    assert y_bf16.shape == x_bf16.shape and y_bf16.dtype == x_bf16.dtype
    assert jnp.allclose(
        y_bf16.astype(jnp.float32),
        gelu_ref(x_bf16).astype(jnp.float32),
        atol=5e-2, rtol=5e-2,
    )

    print("KERNEL_OK")
</pallas_src>

<mosaic_0001>
module attributes {stable_mosaic.version = 11 : i64} {
  func.func @_gelu_kernel(%arg0: i32, %arg1: memref<16x32xf32, #tpu.memory_space<vmem>>, %arg2: memref<16x32xf32, #tpu.memory_space<vmem>>) attributes {dimension_semantics = [#tpu.dimension_semantics<parallel>], iteration_bounds = array<i64: 1>, scalar_prefetch = 0 : i64, scratch_operands = 0 : i64, tpu.core_type = #tpu.core_type<tc>, window_params = [{transform_indices = @transform_0, window_bounds = array<i64: 16, 32>}, {transform_indices = @transform_1, window_bounds = array<i64: 16, 32>}]} {
    %c0 = arith.constant 0 : index
    %c0_0 = arith.constant 0 : index
    %0 = vector.load %arg1[%c0, %c0_0] : memref<16x32xf32, #tpu.memory_space<vmem>>, vector<16x32xf32>
    %cst = arith.constant 1.702000e+00 : f32
    %1 = vector.broadcast %cst : f32 to vector<16x32xf32>
    %2 = arith.mulf %1, %0 : vector<16x32xf32>
    %3 = arith.negf %2 : vector<16x32xf32>
    %4 = math.exp %3 : vector<16x32xf32>
    %cst_1 = arith.constant 1.000000e+00 : f32
    %5 = vector.broadcast %cst_1 : f32 to vector<16x32xf32>
    %6 = arith.addf %5, %4 : vector<16x32xf32>
    %7 = arith.divf %5, %6 : vector<16x32xf32>
    %8 = arith.mulf %0, %7 : vector<16x32xf32>
    %c0_2 = arith.constant 0 : index
    %c0_3 = arith.constant 0 : index
    %9 = vector.load %arg2[%c0_2, %c0_3] : memref<16x32xf32, #tpu.memory_space<vmem>>, vector<16x32xf32>
    tpu.vector_store %arg2[%c0_2, %c0_3], %8 {strides = array<i32>} : memref<16x32xf32, #tpu.memory_space<vmem>>, vector<16x32xf32>,
    return
  }
  func.func @transform_0(%arg0: i32) -> (i32, i32) {
    %c0_i32 = arith.constant 0 : i32
    %c0_i32_0 = arith.constant 0 : i32
    return %arg0, %c0_i32 : i32, i32
  }
  func.func @transform_1(%arg0: i32) -> (i32, i32) {
    %c0_i32 = arith.constant 0 : i32
    %c0_i32_0 = arith.constant 0 : i32
    return %arg0, %c0_i32 : i32, i32
  }
}

</mosaic_0001>

<bundles_post_ra>
// kernel: tpu_custom_call.1
= control target key start
LH: loop header
LB: loop body
LE: loop exit
PB: predicated region body
PF: predicated region fallthrough
CT: control target
= control target key end

     0   :  { %6 = vsyncpa [#allocation3], 0  ;;  %s167_s0 = inlined_call_operand.hbm [shape: f32[16,32], index: 0, kind: input, shape index: {}]   ;;  %s168_s1 = inlined_call_operand.hbm [shape: f32[16,32], index: 1, kind: output, shape index: {}]  }
   0x1   :  { %7 = vsyncpa [#allocation4], 0  ;;  %s123_s6 = smov [#allocation2]   ;;  %s75_s10 = scalar_lea.hbm %s167_s0, 256 }
   0x2   :  { %s13_s7 = sshll.u32 %s123_s6, 4  ;;  %p76_p0 = scmp.ne.s32.totalorder %s167_s0, %s75_s10  ;;  %s14_s7 = int_to_ptr.vmem [resolvable:$true] %s13_s7 }
   0x3   :  { %p79_p1 = scmp.lt.u32.totalorder %s75_s10, %s167_s0 }
   0x5   :  { %p81_p2 = pnand %p79_p1, %p76_p0 }
   0x7   :  { %84 = shalt.err (!%p81_p2)
}
   0x8   :  { %s85_s15 = scalar_lea.vmem %s14_s7, 256  ;;  %p90_p4 = scmp.lt.s32.totalorder %s14_s7, %s14_s7 }
   0x9   :  { %p86_p3 = scmp.ne.s32.totalorder %s14_s7, %s85_s15  ;;  %p91_p5 = scmp.lt.s32.totalorder %s85_s15, %s85_s15 }
   0xb   :  { %p92_p6 = por %p91_p5, %p90_p4 }
   0xd   :  { %p93_p7 = pnand %p92_p6, %p86_p3 }
   0xf   :  { %96 = shalt.err (!%p93_p7)
}
  0x10   :  { %s124_s16 = smov 128   ;;  %s125_s17 = smov 8  }
  0x11   :  { %19 = dma.hbm_to_vmem [thread:$0]  %s167_s0, 256, %s14_s7, [#allocation3], %s124_s16, %s124_s16, %s125_s17  }
  0x12   :  { %119 = dma.done.wait [#allocation3], 256  }
  0x13   :  { %120 = vsyncadd [#allocation3], 4294967040  ;;  %v23_v0 = vld [vmem:[#allocation2] sm:$0xff]  ;;  %v24_v1 = vld [vmem:[#allocation2 + $0x8] sm:$0xff]  ;;  %s126_s20 = smov [#allocation5]   ;;  %vm41_vm0 = vcmask 261120  }
  0x14   :  { %v61_v2 = vmul.f32 -1.702, %v23_v0  ;;  %v62_v3 = vmul.f32 -1.702, %v24_v1  ;;  %s49_s21 = sshll.u32 %s126_s20, 4  ;;  %s50_s21 = int_to_ptr.vmem [resolvable:$true] %s49_s21 }
  0x15   :  { %s97_s0 = scalar_lea.vmem %s50_s21, 256  ;;  %p102_p9 = scmp.lt.s32.totalorder %s50_s21, %s50_s21 }
  0x16   :  { %v29_v4 = vmul.f32 1.442695, %v61_v2  ;;  %v31_v5 = vmul.f32 1.442695, %v62_v3  ;;  %p98_p8 = scmp.ne.s32.totalorder %s50_s21, %s97_s0  ;;  %p103_p10 = scmp.lt.s32.totalorder %s97_s0, %s97_s0 }
  0x18   :  { %67 = vpow2.f32 %v29_v4  ;;  %p104_p11 = por %p103_p10, %p102_p9 }
  0x19   :  { %69 = vpow2.f32 %v31_v5 }
  0x1a   :  { %p105_p12 = pnand %p104_p11, %p98_p8 }
  0x22   :  { %v68_v6 = vpop.eup %67 }
  0x23   :  { %v70_v7 = vpop.eup %69  ;;  %v33_v8 = vadd.f32 1.0, %v68_v6 }
  0x24   :  { %v34_v9 = vadd.f32 1.0, %v70_v7 }
  0x25   :  { %71 = vrcp.f32 %v33_v8 }
  0x26   :  { %73 = vrcp.f32 %v34_v9 }
  0x2f   :  { %v72_v10 = vpop.eup %71 }
  0x30   :  { %v74_v11 = vpop.eup %73  ;;  %v39_v12 = vmul.f32 %v72_v10, %v23_v0 }
  0x31   :  { %v40_v13 = vmul.f32 %v74_v11, %v24_v1 }
  0x32   :  { %42 = vst.msk [vmem:[#allocation5] sm:$0xff] %vm41_vm0, %v39_v12 }
  0x33   :  { %43 = vst.msk [vmem:[#allocation5 + $0x8] sm:$0xff] %vm41_vm0, %v40_v13 }
  0x34   :  { %108 = shalt.err (!%p105_p12)
}
  0x35   :  { %s109_s24 = scalar_lea.hbm %s168_s1, 256 }
  0x36   :  { %p110_p13 = scmp.ne.s32.totalorder %s168_s1, %s109_s24  ;;  %p113_p0 = scmp.lt.u32.totalorder %s109_s24, %s168_s1 }
  0x38   :  { %p115_p1 = pnand %p113_p0, %p110_p13 }
  0x3a   :  { %118 = shalt.err (!%p115_p1)
}
  0x3b   :  { %55 = dma.vmem_to_hbm [thread:$0]  %s50_s21, 256, %s168_s1, [#allocation4], %s124_s16, %s124_s16, %s125_s17  }
  0x3c   :  { %121 = dma.done.wait [#allocation4], 256  }
  0x3d   :  { %122 = vsyncadd [#allocation4], 4294967040 }
  0x3e   :  { %59 = vsyncpa [#allocation3], 1 }
  0x3f   :  { %60 = vsyncpa [#allocation4], 1 }

</bundles_post_ra>
